<compile_context>
chip_gen: v5e
topology: v5e:2x2
jax: 0.10.0
libtpu: 0.0.40
codegen_flags: <defaults>
</compile_context>

<pallas_src>
import jax
import jax.numpy as jnp
from jax.experimental import pallas as pl
from jax.experimental.pallas import tpu as pltpu

NUM_CLASSES = 8
C_IN = 512      # backbone output channels (nn.Conv2d(512, ...))
C_MID = 1024    # conv_transform output channels (folded away algebraically)


def _add_gcn_kernel(x_ref, wstack_ref, b2_ref, blr_ref, mm_ref, out_ref):
    """One block of G samples per grid step.

    x_ref      : (G, C_IN, HW)  features, natural post-backbone layout
    wstack_ref : (16, C_IN)     rows 0:8 = fc weight, rows 8:16 = wl @ wt
    b2_ref     : (8, 1)         wl @ conv_transform bias
    blr_ref    : (8, 1)         last_linear bias
    mm_ref     : (8, 8)         mask_mat (learnable, NOT assumed identity)
    out_ref    : (1, 8, G)      (out1 + out2) / 2 per sample (classes x sample)
    """
    g = x_ref.shape[0]

    # Hoist shared operands out of the sample loop (no CSE of broadcasts).
    w = wstack_ref[...]                                              # (16, C_IN)
    b2 = b2_ref[...]                                                 # (8, 1)
    blr = blr_ref[...]                                               # (8, 1)
    mm = mm_ref[...]                                                 # (8, 8)

    cols = []
    for j in range(g):                                               # static unroll
        x_j = x_ref[j]                                               # (C_IN, HW)
        # Single stacked 512-contraction matmul for this sample.
        z = jnp.dot(w, x_j, preferred_element_type=jnp.float32)      # (16, HW)
        fc_j = z[:NUM_CLASSES, :]                                    # (8, HW)
        y_j = z[NUM_CLASSES:, :] + b2                                # (8, HW)
        mask_j = jax.nn.sigmoid(fc_j)                                # (8, HW)
        # forward_classification_sm: topk(1, dim=-1).mean(-1) == spatial max
        out1_j = jnp.max(fc_j, axis=-1, keepdims=True)               # (8, 1)
        # out2_full[o, c] = sum_p y_j[o, p] * mask_j[c, p]  (+ last_linear bias)
        o2f_j = jax.lax.dot_general(
            y_j, mask_j, (((1,), (1,)), ((), ())),
            preferred_element_type=jnp.float32) + blr                # (8, 8)
        out2_j = jnp.sum(o2f_j * mm, axis=-1, keepdims=True)         # (8, 1)
        cols.append((out1_j + out2_j) * 0.5)
    out_ref[0] = jnp.concatenate(cols, axis=1)                       # (8, G)


def _pick_group(bt, hw, c_in, vmem_budget=8 * 1024 * 1024):
    """Largest divisor G of BT whose double-buffered f32 x block fits VMEM,
    preferring >= 2 grid steps (keeps both v7x TensorCores busy)."""
    divisors = [d for d in range(1, bt + 1) if bt % d == 0]

    def fits(d):
        return 2 * d * c_in * hw * 4 <= vmem_budget      # double-buffered block

    cands = [d for d in divisors if fits(d) and bt // d >= 2]
    if cands:
        return max(cands)
    cands = [d for d in divisors if fits(d)]
    if cands:
        return max(cands)
    return 1


def add_gcn_head(x_feat, params):
    """x_feat: (B, T, C_IN, H, W) post-backbone features -> (out, out), out: (B, 8)."""
    wfc, wt, bt_bias, wl, bl_bias, mm = params
    b, t, c, h, w = x_feat.shape
    bt = b * t
    hw = h * w

    # Algebraic collapse (exact up to FP reassociation):
    #   wl @ (wt @ x + btr) == (wl @ wt) @ x + (wl @ btr)
    hi = jax.lax.Precision.HIGHEST
    w2 = jnp.dot(wl, wt, precision=hi)                                # (8, C_IN)
    b2 = jnp.dot(wl, bt_bias, precision=hi)                           # (8, 1)
    wstack = jnp.concatenate([wfc, w2], axis=0).astype(jnp.float32)   # (16, C_IN)

    # Natural layout, contiguous reshape only -- no HBM transpose.
    x = x_feat.reshape(bt, c, hw).astype(jnp.float32)                 # (BT, C_IN, HW)

    g = _pick_group(bt, hw, c)
    nb = bt // g

    out = pl.pallas_call(
        _add_gcn_kernel,
        out_shape=jax.ShapeDtypeStruct((nb, NUM_CLASSES, g), jnp.float32),
        grid_spec=pltpu.PrefetchScalarGridSpec(
            num_scalar_prefetch=0,
            grid=(nb,),
            in_specs=[
                pl.BlockSpec((g, c, hw), lambda i: (i, 0, 0)),
                pl.BlockSpec((2 * NUM_CLASSES, c), lambda i: (0, 0)),
                pl.BlockSpec((NUM_CLASSES, 1), lambda i: (0, 0)),
                pl.BlockSpec((NUM_CLASSES, 1), lambda i: (0, 0)),
                pl.BlockSpec((NUM_CLASSES, NUM_CLASSES), lambda i: (0, 0)),
            ],
            out_specs=pl.BlockSpec((1, NUM_CLASSES, g), lambda i: (i, 0, 0)),
        ),
        compiler_params=pltpu.CompilerParams(dimension_semantics=("parallel",)),
    )(x, wstack, b2.astype(jnp.float32), bl_bias.astype(jnp.float32),
      mm.astype(jnp.float32))

    # out[i, :, j] is sample i*g + j  ->  (BT, 8)
    out_bt = jnp.transpose(out, (0, 2, 1)).reshape(bt, NUM_CLASSES)
    out_final = out_bt.reshape(b, t, NUM_CLASSES).mean(axis=1)        # (B, 8)
    return out_final, out_final


def add_gcn_reference(x_feat, params):
    """Pure-JAX reference of the original (un-collapsed) forward pass."""
    wfc, wt, bt_bias, wl, bl_bias, mm = params
    hi = jax.lax.Precision.HIGHEST
    b, t, c, h, w = x_feat.shape
    x = x_feat.reshape(b * t, c, h * w).astype(jnp.float32)
    fc_out = jnp.einsum('oc,ncp->nop', wfc, x, precision=hi)
    out1 = fc_out.max(axis=-1)                                        # (BT, 8)
    mask = jax.nn.sigmoid(fc_out)                                     # (BT, 8, P)
    xt = jnp.einsum('mc,ncp->nmp', wt, x, precision=hi) + bt_bias[:, 0][None, :, None]
    v = jnp.einsum('nmp,nop->nmo', xt, mask, precision=hi)            # (BT, 1024, 8)
    out2_full = jnp.einsum('cm,nmk->nck', wl, v, precision=hi) + bl_bias[:, 0][None, :, None]
    out2 = (out2_full * mm).sum(-1)                                   # (BT, 8)
    out = (out1 + out2) / 2.0
    out = out.reshape(b, t, NUM_CLASSES).mean(axis=1)
    return out, out


def init_params(key):
    k1, k2, k3, k4, k5 = jax.random.split(key, 5)
    wfc = 0.02 * jax.random.normal(k1, (NUM_CLASSES, C_IN), jnp.float32)
    wt = 0.02 * jax.random.normal(k2, (C_MID, C_IN), jnp.float32)
    bt_bias = 0.02 * jax.random.normal(k3, (C_MID, 1), jnp.float32)
    wl = 0.02 * jax.random.normal(k4, (NUM_CLASSES, C_MID), jnp.float32)
    bl_bias = 0.02 * jax.random.normal(k5, (NUM_CLASSES, 1), jnp.float32)
    mm = jnp.eye(NUM_CLASSES, dtype=jnp.float32)   # mask_mat parameter (detached eye)
    return (wfc, wt, bt_bias, wl, bl_bias, mm)


if __name__ == "__main__":
    key = jax.random.PRNGKey(0)
    kx, kp = jax.random.split(key)

    B, T, H, W = 2, 4, 8, 8
    x_feat = jax.random.normal(kx, (B, T, C_IN, H, W), jnp.float32)
    params = init_params(kp)

    out, _ = add_gcn_head(x_feat, params)
    out = jax.block_until_ready(out)

    ref, _ = add_gcn_reference(x_feat, params)
    ref = jax.block_until_ready(ref)

    assert out.shape == (B, NUM_CLASSES)
    # Tolerance covers the FP reassociation from the (wl@wt) pre-collapse.
    assert jnp.allclose(out, ref, rtol=1e-3, atol=1e-3), (out, ref)
    print("KERNEL_OK")
</pallas_src>

<mosaic_0001>
module attributes {stable_mosaic.version = 11 : i64} {
  func.func @_add_gcn_kernel(%arg0: i32, %arg1: memref<4x512x64xf32, #tpu.memory_space<vmem>>, %arg2: memref<16x512xf32, #tpu.memory_space<vmem>>, %arg3: memref<8x1xf32, #tpu.memory_space<vmem>>, %arg4: memref<8x1xf32, #tpu.memory_space<vmem>>, %arg5: memref<8x8xf32, #tpu.memory_space<vmem>>, %arg6: memref<1x8x4xf32, #tpu.memory_space<vmem>>) attributes {dimension_semantics = [#tpu.dimension_semantics<parallel>], iteration_bounds = array<i64: 2>, scalar_prefetch = 0 : i64, scratch_operands = 0 : i64, tpu.core_type = #tpu.core_type<tc>, window_params = [{transform_indices = @transform_0, window_bounds = array<i64: 4, 512, 64>}, {pipeline_mode = #tpu.pipeline_mode<synchronous>, transform_indices = @transform_1, window_bounds = array<i64: 16, 512>}, {pipeline_mode = #tpu.pipeline_mode<synchronous>, transform_indices = @transform_2, window_bounds = array<i64: 8, 1>}, {pipeline_mode = #tpu.pipeline_mode<synchronous>, transform_indices = @transform_3, window_bounds = array<i64: 8, 1>}, {pipeline_mode = #tpu.pipeline_mode<synchronous>, transform_indices = @transform_4, window_bounds = array<i64: 8, 8>}, {transform_indices = @transform_5, window_bounds = array<i64: 1, 8, 4>}]} {
    %c0 = arith.constant 0 : index
    %c0_0 = arith.constant 0 : index
    %0 = vector.load %arg2[%c0, %c0_0] : memref<16x512xf32, #tpu.memory_space<vmem>>, vector<16x512xf32>
    %c0_1 = arith.constant 0 : index
    %c0_2 = arith.constant 0 : index
    %1 = vector.load %arg3[%c0_1, %c0_2] : memref<8x1xf32, #tpu.memory_space<vmem>>, vector<8x1xf32>
    %c0_3 = arith.constant 0 : index
    %c0_4 = arith.constant 0 : index
    %2 = vector.load %arg4[%c0_3, %c0_4] : memref<8x1xf32, #tpu.memory_space<vmem>>, vector<8x1xf32>
    %c0_5 = arith.constant 0 : index
    %c0_6 = arith.constant 0 : index
    %3 = vector.load %arg5[%c0_5, %c0_6] : memref<8x8xf32, #tpu.memory_space<vmem>>, vector<8x8xf32>
    %c0_7 = arith.constant 0 : index
    %c0_8 = arith.constant 0 : index
    %c0_9 = arith.constant 0 : index
    %4 = vector.load %arg1[%c0_7, %c0_8, %c0_9] : memref<4x512x64xf32, #tpu.memory_space<vmem>>, vector<1x512x64xf32>
    %5 = vector.shape_cast %4 : vector<1x512x64xf32> to vector<512x64xf32>
    %cst = arith.constant dense<0.000000e+00> : vector<16x64xf32>
    %6 = tpu.matmul %0, %5, %cst {dimension_numbers = #tpu.dot_dimension_numbers<[1], [0], [0], [1], [0, 0, 1, 1], [], []>} : vector<16x512xf32>, vector<512x64xf32>, vector<16x64xf32> -> vector<16x64xf32>
    %7 = vector.extract_strided_slice %6 {offsets = [0, 0], sizes = [8, 64], strides = [1, 1]} : vector<16x64xf32> to vector<8x64xf32>
    %8 = vector.extract_strided_slice %6 {offsets = [8, 0], sizes = [8, 64], strides = [1, 1]} : vector<16x64xf32> to vector<8x64xf32>
    %9 = vector.broadcast %1 : vector<8x1xf32> to vector<8x64xf32>
    %10 = arith.addf %8, %9 : vector<8x64xf32>
    %11 = arith.negf %7 : vector<8x64xf32>
    %12 = math.exp %11 : vector<8x64xf32>
    %cst_10 = arith.constant 1.000000e+00 : f32
    %13 = vector.broadcast %cst_10 : f32 to vector<8x64xf32>
    %14 = arith.addf %13, %12 : vector<8x64xf32>
    %15 = arith.divf %13, %14 : vector<8x64xf32>
    %cst_11 = arith.constant dense<0xFF800000> : vector<8xf32>
    %16 = vector.multi_reduction <maximumf>, %7, %cst_11 [1] : vector<8x64xf32> to vector<8xf32>
    %17 = vector.shape_cast %16 : vector<8xf32> to vector<8x1xf32>
    %cst_12 = arith.constant dense<0.000000e+00> : vector<8x8xf32>
    %18 = tpu.matmul %10, %15, %cst_12 {dimension_numbers = #tpu.dot_dimension_numbers<[1], [1], [0], [0], [0, 0, 1, 0], [], []>} : vector<8x64xf32>, vector<8x64xf32>, vector<8x8xf32> -> vector<8x8xf32>
    %19 = vector.broadcast %2 : vector<8x1xf32> to vector<8x8xf32>
    %20 = arith.addf %18, %19 : vector<8x8xf32>
    %21 = arith.mulf %20, %3 : vector<8x8xf32>
    %cst_13 = arith.constant dense<0.000000e+00> : vector<8xf32>
    %22 = vector.multi_reduction <add>, %21, %cst_13 [1] : vector<8x8xf32> to vector<8xf32>
    %23 = vector.shape_cast %22 : vector<8xf32> to vector<8x1xf32>
    %24 = arith.addf %17, %23 : vector<8x1xf32>
    %cst_14 = arith.constant 5.000000e-01 : f32
    %25 = vector.broadcast %cst_14 : f32 to vector<8x1xf32>
    %26 = arith.mulf %24, %25 : vector<8x1xf32>
    %c1 = arith.constant 1 : index
    %c0_15 = arith.constant 0 : index
    %c0_16 = arith.constant 0 : index
    %27 = vector.load %arg1[%c1, %c0_15, %c0_16] : memref<4x512x64xf32, #tpu.memory_space<vmem>>, vector<1x512x64xf32>
    %28 = vector.shape_cast %27 : vector<1x512x64xf32> to vector<512x64xf32>
    %cst_17 = arith.constant dense<0.000000e+00> : vector<16x64xf32>
    %29 = tpu.matmul %0, %28, %cst_17 {dimension_numbers = #tpu.dot_dimension_numbers<[1], [0], [0], [1], [0, 0, 1, 1], [], []>} : vector<16x512xf32>, vector<512x64xf32>, vector<16x64xf32> -> vector<16x64xf32>
    %30 = vector.extract_strided_slice %29 {offsets = [0, 0], sizes = [8, 64], strides = [1, 1]} : vector<16x64xf32> to vector<8x64xf32>
    %31 = vector.extract_strided_slice %29 {offsets = [8, 0], sizes = [8, 64], strides = [1, 1]} : vector<16x64xf32> to vector<8x64xf32>
    %32 = vector.broadcast %1 : vector<8x1xf32> to vector<8x64xf32>
    %33 = arith.addf %31, %32 : vector<8x64xf32>
    %34 = arith.negf %30 : vector<8x64xf32>
    %35 = math.exp %34 : vector<8x64xf32>
    %cst_18 = arith.constant 1.000000e+00 : f32
    %36 = vector.broadcast %cst_18 : f32 to vector<8x64xf32>
    %37 = arith.addf %36, %35 : vector<8x64xf32>
    %38 = arith.divf %36, %37 : vector<8x64xf32>
    %cst_19 = arith.constant dense<0xFF800000> : vector<8xf32>
    %39 = vector.multi_reduction <maximumf>, %30, %cst_19 [1] : vector<8x64xf32> to vector<8xf32>
    %40 = vector.shape_cast %39 : vector<8xf32> to vector<8x1xf32>
    %cst_20 = arith.constant dense<0.000000e+00> : vector<8x8xf32>
    %41 = tpu.matmul %33, %38, %cst_20 {dimension_numbers = #tpu.dot_dimension_numbers<[1], [1], [0], [0], [0, 0, 1, 0], [], []>} : vector<8x64xf32>, vector<8x64xf32>, vector<8x8xf32> -> vector<8x8xf32>
    %42 = vector.broadcast %2 : vector<8x1xf32> to vector<8x8xf32>
    %43 = arith.addf %41, %42 : vector<8x8xf32>
    %44 = arith.mulf %43, %3 : vector<8x8xf32>
    %cst_21 = arith.constant dense<0.000000e+00> : vector<8xf32>
    %45 = vector.multi_reduction <add>, %44, %cst_21 [1] : vector<8x8xf32> to vector<8xf32>
    %46 = vector.shape_cast %45 : vector<8xf32> to vector<8x1xf32>
    %47 = arith.addf %40, %46 : vector<8x1xf32>
    %cst_22 = arith.constant 5.000000e-01 : f32
    %48 = vector.broadcast %cst_22 : f32 to vector<8x1xf32>
    %49 = arith.mulf %47, %48 : vector<8x1xf32>
    %c2 = arith.constant 2 : index
    %c0_23 = arith.constant 0 : index
    %c0_24 = arith.constant 0 : index
    %50 = vector.load %arg1[%c2, %c0_23, %c0_24] : memref<4x512x64xf32, #tpu.memory_space<vmem>>, vector<1x512x64xf32>
    %51 = vector.shape_cast %50 : vector<1x512x64xf32> to vector<512x64xf32>
    %cst_25 = arith.constant dense<0.000000e+00> : vector<16x64xf32>
    %52 = tpu.matmul %0, %51, %cst_25 {dimension_numbers = #tpu.dot_dimension_numbers<[1], [0], [0], [1], [0, 0, 1, 1], [], []>} : vector<16x512xf32>, vector<512x64xf32>, vector<16x64xf32> -> vector<16x64xf32>
    %53 = vector.extract_strided_slice %52 {offsets = [0, 0], sizes = [8, 64], strides = [1, 1]} : vector<16x64xf32> to vector<8x64xf32>
    %54 = vector.extract_strided_slice %52 {offsets = [8, 0], sizes = [8, 64], strides = [1, 1]} : vector<16x64xf32> to vector<8x64xf32>
    %55 = vector.broadcast %1 : vector<8x1xf32> to vector<8x64xf32>
    %56 = arith.addf %54, %55 : vector<8x64xf32>
    %57 = arith.negf %53 : vector<8x64xf32>
    %58 = math.exp %57 : vector<8x64xf32>
    %cst_26 = arith.constant 1.000000e+00 : f32
    %59 = vector.broadcast %cst_26 : f32 to vector<8x64xf32>
    %60 = arith.addf %59, %58 : vector<8x64xf32>
    %61 = arith.divf %59, %60 : vector<8x64xf32>
    %cst_27 = arith.constant dense<0xFF800000> : vector<8xf32>
    %62 = vector.multi_reduction <maximumf>, %53, %cst_27 [1] : vector<8x64xf32> to vector<8xf32>
    %63 = vector.shape_cast %62 : vector<8xf32> to vector<8x1xf32>
    %cst_28 = arith.constant dense<0.000000e+00> : vector<8x8xf32>
    %64 = tpu.matmul %56, %61, %cst_28 {dimension_numbers = #tpu.dot_dimension_numbers<[1], [1], [0], [0], [0, 0, 1, 0], [], []>} : vector<8x64xf32>, vector<8x64xf32>, vector<8x8xf32> -> vector<8x8xf32>
    %65 = vector.broadcast %2 : vector<8x1xf32> to vector<8x8xf32>
    %66 = arith.addf %64, %65 : vector<8x8xf32>
    %67 = arith.mulf %66, %3 : vector<8x8xf32>
    %cst_29 = arith.constant dense<0.000000e+00> : vector<8xf32>
    %68 = vector.multi_reduction <add>, %67, %cst_29 [1] : vector<8x8xf32> to vector<8xf32>
    %69 = vector.shape_cast %68 : vector<8xf32> to vector<8x1xf32>
    %70 = arith.addf %63, %69 : vector<8x1xf32>
    %cst_30 = arith.constant 5.000000e-01 : f32
    %71 = vector.broadcast %cst_30 : f32 to vector<8x1xf32>
    %72 = arith.mulf %70, %71 : vector<8x1xf32>
    %c3 = arith.constant 3 : index
    %c0_31 = arith.constant 0 : index
    %c0_32 = arith.constant 0 : index
    %73 = vector.load %arg1[%c3, %c0_31, %c0_32] : memref<4x512x64xf32, #tpu.memory_space<vmem>>, vector<1x512x64xf32>
    %74 = vector.shape_cast %73 : vector<1x512x64xf32> to vector<512x64xf32>
    %cst_33 = arith.constant dense<0.000000e+00> : vector<16x64xf32>
    %75 = tpu.matmul %0, %74, %cst_33 {dimension_numbers = #tpu.dot_dimension_numbers<[1], [0], [0], [1], [0, 0, 1, 1], [], []>} : vector<16x512xf32>, vector<512x64xf32>, vector<16x64xf32> -> vector<16x64xf32>
    %76 = vector.extract_strided_slice %75 {offsets = [0, 0], sizes = [8, 64], strides = [1, 1]} : vector<16x64xf32> to vector<8x64xf32>
    %77 = vector.extract_strided_slice %75 {offsets = [8, 0], sizes = [8, 64], strides = [1, 1]} : vector<16x64xf32> to vector<8x64xf32>
    %78 = vector.broadcast %1 : vector<8x1xf32> to vector<8x64xf32>
    %79 = arith.addf %77, %78 : vector<8x64xf32>
    %80 = arith.negf %76 : vector<8x64xf32>
    %81 = math.exp %80 : vector<8x64xf32>
    %cst_34 = arith.constant 1.000000e+00 : f32
    %82 = vector.broadcast %cst_34 : f32 to vector<8x64xf32>
    %83 = arith.addf %82, %81 : vector<8x64xf32>
    %84 = arith.divf %82, %83 : vector<8x64xf32>
    %cst_35 = arith.constant dense<0xFF800000> : vector<8xf32>
    %85 = vector.multi_reduction <maximumf>, %76, %cst_35 [1] : vector<8x64xf32> to vector<8xf32>
    %86 = vector.shape_cast %85 : vector<8xf32> to vector<8x1xf32>
    %cst_36 = arith.constant dense<0.000000e+00> : vector<8x8xf32>
    %87 = tpu.matmul %79, %84, %cst_36 {dimension_numbers = #tpu.dot_dimension_numbers<[1], [1], [0], [0], [0, 0, 1, 0], [], []>} : vector<8x64xf32>, vector<8x64xf32>, vector<8x8xf32> -> vector<8x8xf32>
    %88 = vector.broadcast %2 : vector<8x1xf32> to vector<8x8xf32>
    %89 = arith.addf %87, %88 : vector<8x8xf32>
    %90 = arith.mulf %89, %3 : vector<8x8xf32>
    %cst_37 = arith.constant dense<0.000000e+00> : vector<8xf32>
    %91 = vector.multi_reduction <add>, %90, %cst_37 [1] : vector<8x8xf32> to vector<8xf32>
    %92 = vector.shape_cast %91 : vector<8xf32> to vector<8x1xf32>
    %93 = arith.addf %86, %92 : vector<8x1xf32>
    %cst_38 = arith.constant 5.000000e-01 : f32
    %94 = vector.broadcast %cst_38 : f32 to vector<8x1xf32>
    %95 = arith.mulf %93, %94 : vector<8x1xf32>
    %96 = tpu.concatenate %26, %49, %72, %95 in 1 : vector<8x1xf32>, vector<8x1xf32>, vector<8x1xf32>, vector<8x1xf32> -> vector<8x4xf32>
    %c0_39 = arith.constant 0 : index
    %c0_40 = arith.constant 0 : index
    %c0_41 = arith.constant 0 : index
    %97 = vector.load %arg6[%c0_39, %c0_40, %c0_41] : memref<1x8x4xf32, #tpu.memory_space<vmem>>, vector<1x8x4xf32>
    %98 = vector.shape_cast %97 : vector<1x8x4xf32> to vector<8x4xf32>
    %99 = vector.shape_cast %96 : vector<8x4xf32> to vector<1x8x4xf32>
    tpu.vector_store %arg6[%c0_39, %c0_40, %c0_41], %99 {strides = array<i32>} : memref<1x8x4xf32, #tpu.memory_space<vmem>>, vector<1x8x4xf32>,
    return
  }
  func.func @transform_0(%arg0: i32) -> (i32, i32, i32) {
    %c0_i32 = arith.constant 0 : i32
    %c0_i32_0 = arith.constant 0 : i32
    %c0_i32_1 = arith.constant 0 : i32
    return %arg0, %c0_i32, %c0_i32_0 : i32, i32, i32
  }
  func.func @transform_1(%arg0: i32) -> (i32, i32) {
    %c0_i32 = arith.constant 0 : i32
    %c0_i32_0 = arith.constant 0 : i32
    %c0_i32_1 = arith.constant 0 : i32
    return %c0_i32, %c0_i32_0 : i32, i32
  }
  func.func @transform_2(%arg0: i32) -> (i32, i32) {
    %c0_i32 = arith.constant 0 : i32
    %c0_i32_0 = arith.constant 0 : i32
    %c0_i32_1 = arith.constant 0 : i32
    return %c0_i32, %c0_i32_0 : i32, i32
  }
  func.func @transform_3(%arg0: i32) -> (i32, i32) {
    %c0_i32 = arith.constant 0 : i32
    %c0_i32_0 = arith.constant 0 : i32
    %c0_i32_1 = arith.constant 0 : i32
    return %c0_i32, %c0_i32_0 : i32, i32
  }
  func.func @transform_4(%arg0: i32) -> (i32, i32) {
    %c0_i32 = arith.constant 0 : i32
    %c0_i32_0 = arith.constant 0 : i32
    %c0_i32_1 = arith.constant 0 : i32
    return %c0_i32, %c0_i32_0 : i32, i32
  }
  func.func @transform_5(%arg0: i32) -> (i32, i32, i32) {
    %c0_i32 = arith.constant 0 : i32
    %c0_i32_0 = arith.constant 0 : i32
    %c0_i32_1 = arith.constant 0 : i32
    return %arg0, %c0_i32, %c0_i32_0 : i32, i32, i32
  }
}

</mosaic_0001>

<bundles_post_ra>
// kernel: tpu_custom_call.1
= control target key start
LH: loop header
LB: loop body
LE: loop exit
PB: predicated region body
PF: predicated region fallthrough
CT: control target
= control target key end

     0   :  { %s1447_s18 = smov 0   ;;  %s1864_s0 = inlined_call_operand.vmem [shape: f32[8,512,64], index: 0, kind: input, shape index: {}]   ;;  %s1865_s1 = inlined_call_operand.vmem [shape: f32[16,512], index: 1, kind: input, shape index: {}]   ;;  %s1866_s2 = inlined_call_operand.vmem [shape: f32[8,1], index: 2, kind: input, shape index: {}]   ;;  %s1867_s3 = inlined_call_operand.vmem [shape: f32[8,1], index: 3, kind: input, shape index: {}]   ;;  %s1868_s4 = inlined_call_operand.vmem [shape: f32[8,8], index: 4, kind: input, shape index: {}]   ;;  %s1869_s5 = inlined_call_operand.vmem [shape: f32[2,8,4], index: 5, kind: output, shape index: {}]  }
   0x1 LB: > { %s1453_s19 = sadd.s32 4294967295, %s1414_s18   ;;  %p1163_p0 = scmp.ge.s32.totalorder %s1414_s18, 1  ;;  %s1414_s18 = sphi %s1447_s18, %s15_s18  }
   0x2   : > { %p189_p1 = scmp.lt.s32.totalorder %s1414_s18, 3 }
   0x4   : > { %p190_p2 = pnand %p1163_p0, %p189_p1 }
   0x5   : > { %s1164_s20 = sshll.u32 (!%p190_p2), %s1453_s19, 2  ;;  %p224_p4 = scmp.lt.s32.totalorder (!%p190_p2), %s1453_s19, 1 }
   0x6   : > { %193 = sbr.rel (%p190_p2) target bundleno = 1052 (0x41c), region = 40  ;;  %p218_p3 = scmp.lt.s32.totalorder (!%p190_p2), %s1164_s20, 7 }
   0xb   : > { %s1871_s20 = smov (!%p218_p3, %s1164_s20), 7  ;;  %v1528_v62 = vld [vmem:[%s1865_s1 + $0x10] sm:$0xff]  ;;  %v1533_v63 = vld [vmem:[%s1865_s1 + $0x18] sm:$0xff]  ;;  %vm420_vm0 = vcmask 523264   ;;  %vm456_vm5 = vcmask 64512   ;;  %s1873_s19 = smov (!%p224_p4, %s1453_s19), 1 }
   0xc   : > { %s1374_s21 = sshll.u32 %s1871_s20, 9 }
   0xd   : > { %s1461_s24 = scalar_lea.vmem %s1864_s0, %s1374_s21 }
   0xe   : > { %v286_v0 = vld [vmem:[%s1461_s24 + $0x178] sm:$0xff]  ;;  %v285_v1 = vld [vmem:[%s1461_s24 + $0x170] sm:$0xff]  ;;  %v284_v5 = vld [vmem:[%s1461_s24 + $0x168] sm:$0xff] }
   0xf   : > { %v302_v2 = vld [vmem:[%s1461_s24 + $0x1f8] sm:$0xff]  ;;  %349 = vmatpush.msra.mxu2 %v286_v0  ;;  %v301_v6 = vld [vmem:[%s1461_s24 + $0x1f0] sm:$0xff]  ;;  %v300_v9 = vld [vmem:[%s1461_s24 + $0x1e8] sm:$0xff] }
  0x10   : > { %372 = vmatpush.msra.mxu3 %v302_v2  ;;  %v254_v3 = vld [vmem:[%s1461_s24 + $0x78] sm:$0xff]  ;;  %v253_v7 = vld [vmem:[%s1461_s24 + $0x70] sm:$0xff]  ;;  %v252_v10 = vld [vmem:[%s1461_s24 + $0x68] sm:$0xff] }
  0x11   : > { %v270_v4 = vld [vmem:[%s1461_s24 + $0xf8] sm:$0xff]  ;;  %303 = vmatpush.msra.mxu0 %v254_v3  ;;  %v269_v8 = vld [vmem:[%s1461_s24 + $0xf0] sm:$0xff]  ;;  %350 = vmatpush.msra.mxu2 %v285_v1  ;;  %v283_v11 = vld [vmem:[%s1461_s24 + $0x160] sm:$0xff] }
  0x12   : > { %326 = vmatpush.msra.mxu1 %v270_v4  ;;  %373 = vmatpush.msra.mxu3 %v301_v6  ;;  %v268_v12 = vld [vmem:[%s1461_s24 + $0xe8] sm:$0xff]  ;;  %v299_v13 = vld [vmem:[%s1461_s24 + $0x1e0] sm:$0xff]  ;;  %v282_v16 = vld [vmem:[%s1461_s24 + $0x158] sm:$0xff] }
  0x13   : > { %304 = vmatpush.msra.mxu0 %v253_v7  ;;  %351 = vmatpush.msra.mxu2 %v284_v5  ;;  %v251_v14 = vld [vmem:[%s1461_s24 + $0x60] sm:$0xff]  ;;  %v298_v17 = vld [vmem:[%s1461_s24 + $0x1d8] sm:$0xff]  ;;  %v281_v20 = vld [vmem:[%s1461_s24 + $0x150] sm:$0xff]  ;;  %v1416_v5 = vmov 0  }
  0x14   : > { %327 = vmatpush.msra.mxu1 %v269_v8  ;;  %374 = vmatpush.msra.mxu3 %v300_v9  ;;  %v267_v15 = vld [vmem:[%s1461_s24 + $0xe0] sm:$0xff]  ;;  %v250_v18 = vld [vmem:[%s1461_s24 + $0x58] sm:$0xff]  ;;  %v297_v21 = vld [vmem:[%s1461_s24 + $0x1d0] sm:$0xff] }
  0x15   : > { %305 = vmatpush.msra.mxu0 %v252_v10  ;;  %352 = vmatpush.msra.mxu2 %v283_v11  ;;  %v266_v19 = vld [vmem:[%s1461_s24 + $0xd8] sm:$0xff]  ;;  %v249_v22 = vld [vmem:[%s1461_s24 + $0x50] sm:$0xff]  ;;  %v280_v24 = vld [vmem:[%s1461_s24 + $0x148] sm:$0xff] }
  0x16   : > { %328 = vmatpush.msra.mxu1 %v268_v12  ;;  %375 = vmatpush.msra.mxu3 %v299_v13  ;;  %v265_v23 = vld [vmem:[%s1461_s24 + $0xd0] sm:$0xff]  ;;  %v296_v25 = vld [vmem:[%s1461_s24 + $0x1c8] sm:$0xff]  ;;  %v279_v28 = vld [vmem:[%s1461_s24 + $0x140] sm:$0xff] }
  0x17   : > { %306 = vmatpush.msra.mxu0 %v251_v14  ;;  %353 = vmatpush.msra.mxu2 %v282_v16  ;;  %v248_v26 = vld [vmem:[%s1461_s24 + $0x48] sm:$0xff]  ;;  %v295_v29 = vld [vmem:[%s1461_s24 + $0x1c0] sm:$0xff]  ;;  %v278_v32 = vld [vmem:[%s1461_s24 + $0x138] sm:$0xff] }
  0x18   : > { %329 = vmatpush.msra.mxu1 %v267_v15  ;;  %376 = vmatpush.msra.mxu3 %v298_v17  ;;  %v264_v27 = vld [vmem:[%s1461_s24 + $0xc8] sm:$0xff]  ;;  %v247_v30 = vld [vmem:[%s1461_s24 + $0x40] sm:$0xff]  ;;  %v294_v33 = vld [vmem:[%s1461_s24 + $0x1b8] sm:$0xff] }
  0x19   : > { %307 = vmatpush.msra.mxu0 %v250_v18  ;;  %354 = vmatpush.msra.mxu2 %v281_v20  ;;  %v263_v31 = vld [vmem:[%s1461_s24 + $0xc0] sm:$0xff]  ;;  %v246_v34 = vld [vmem:[%s1461_s24 + $0x38] sm:$0xff]  ;;  %v277_v36 = vld [vmem:[%s1461_s24 + $0x130] sm:$0xff] }
  0x1a   : > { %330 = vmatpush.msra.mxu1 %v266_v19  ;;  %377 = vmatpush.msra.mxu3 %v297_v21  ;;  %v262_v35 = vld [vmem:[%s1461_s24 + $0xb8] sm:$0xff]  ;;  %v293_v37 = vld [vmem:[%s1461_s24 + $0x1b0] sm:$0xff]  ;;  %v276_v40 = vld [vmem:[%s1461_s24 + $0x128] sm:$0xff] }
  0x1b   : > { %308 = vmatpush.msra.mxu0 %v249_v22  ;;  %355 = vmatpush.msra.mxu2 %v280_v24  ;;  %v245_v38 = vld [vmem:[%s1461_s24 + $0x30] sm:$0xff]  ;;  %v292_v41 = vld [vmem:[%s1461_s24 + $0x1a8] sm:$0xff]  ;;  %v275_v44 = vld [vmem:[%s1461_s24 + $0x120] sm:$0xff] }
  0x1c   : > { %331 = vmatpush.msra.mxu1 %v265_v23  ;;  %378 = vmatpush.msra.mxu3 %v296_v25  ;;  %v261_v39 = vld [vmem:[%s1461_s24 + $0xb0] sm:$0xff]  ;;  %v244_v42 = vld [vmem:[%s1461_s24 + $0x28] sm:$0xff]  ;;  %v291_v45 = vld [vmem:[%s1461_s24 + $0x1a0] sm:$0xff] }
  0x1d   : > { %309 = vmatpush.msra.mxu0 %v248_v26  ;;  %356 = vmatpush.msra.mxu2 %v279_v28  ;;  %v260_v43 = vld [vmem:[%s1461_s24 + $0xa8] sm:$0xff]  ;;  %v243_v46 = vld [vmem:[%s1461_s24 + $0x20] sm:$0xff]  ;;  %v274_v48 = vld [vmem:[%s1461_s24 + $0x118] sm:$0xff] }
  0x1e   : > { %332 = vmatpush.msra.mxu1 %v264_v27  ;;  %379 = vmatpush.msra.mxu3 %v295_v29  ;;  %v259_v47 = vld [vmem:[%s1461_s24 + $0xa0] sm:$0xff]  ;;  %v290_v49 = vld [vmem:[%s1461_s24 + $0x198] sm:$0xff]  ;;  %v273_v52 = vld [vmem:[%s1461_s24 + $0x110] sm:$0xff] }
  0x1f   : > { %310 = vmatpush.msra.mxu0 %v247_v30  ;;  %357 = vmatpush.msra.mxu2 %v278_v32  ;;  %v242_v50 = vld [vmem:[%s1461_s24 + $0x18] sm:$0xff]  ;;  %v289_v53 = vld [vmem:[%s1461_s24 + $0x190] sm:$0xff]  ;;  %v272_v56 = vld [vmem:[%s1461_s24 + $0x108] sm:$0xff] }
  0x20   : > { %333 = vmatpush.msra.mxu1 %v263_v31  ;;  %380 = vmatpush.msra.mxu3 %v294_v33  ;;  %v258_v51 = vld [vmem:[%s1461_s24 + $0x98] sm:$0xff]  ;;  %v241_v54 = vld [vmem:[%s1461_s24 + $0x10] sm:$0xff]  ;;  %v288_v57 = vld [vmem:[%s1461_s24 + $0x188] sm:$0xff] }
  0x21   : > { %311 = vmatpush.msra.mxu0 %v246_v34  ;;  %358 = vmatpush.msra.mxu2 %v277_v36  ;;  %v257_v55 = vld [vmem:[%s1461_s24 + $0x90] sm:$0xff]  ;;  %v240_v58 = vld [vmem:[%s1461_s24 + $0x8] sm:$0xff]  ;;  %v271_v60 = vld [vmem:[%s1461_s24 + $0x100] sm:$0xff] }
  0x22   : > { %334 = vmatpush.msra.mxu1 %v262_v35  ;;  %381 = vmatpush.msra.mxu3 %v293_v37  ;;  %v256_v59 = vld [vmem:[%s1461_s24 + $0x88] sm:$0xff]  ;;  %v287_v61 = vld [vmem:[%s1461_s24 + $0x180] sm:$0xff]  ;;  %v1557_v6 = vld [vmem:[%s1865_s1 + $0x30] sm:$0xff] }
  0x23   : > { %312 = vmatpush.msra.mxu0 %v245_v38  ;;  %359 = vmatpush.msra.mxu2 %v276_v40  ;;  %v239_v0 = vld [vmem:[%s1461_s24] sm:$0xff]  ;;  %v1545_v3 = vld [vmem:[%s1865_s1 + $0x8] sm:$0xff]  ;;  %v1562_v7 = vld [vmem:[%s1865_s1 + $0x38] sm:$0xff] }
  0x24   : > { %335 = vmatpush.msra.mxu1 %v261_v39  ;;  %382 = vmatpush.msra.mxu3 %v292_v41  ;;  %v255_v1 = vld [vmem:[%s1461_s24 + $0x80] sm:$0xff]  ;;  %v1572_v9 = vld [vmem:[%s1865_s1 + $0x28] sm:$0xff]  ;;  %v1202_v11 = vld [vmem:[%s1461_s24 + $0x2f8] sm:$0xff] }
  0x25   : > { %313 = vmatpush.msra.mxu0 %v244_v42  ;;  %360 = vmatpush.msra.mxu2 %v275_v44  ;;  %v1540_v2 = vld [vmem:[%s1865_s1] sm:$0xff]  ;;  %v1201_v12 = vld [vmem:[%s1461_s24 + $0x2f0] sm:$0xff]  ;;  %v1218_v13 = vld [vmem:[%s1461_s24 + $0x378] sm:$0xff] }
  0x26   : > { %336 = vmatpush.msra.mxu1 %v260_v43  ;;  %383 = vmatpush.msra.mxu3 %v291_v45  ;;  %v236_v4 = vld [vmem:[%s1866_s2] sm:$0xff]  ;;  %v1217_v14 = vld [vmem:[%s1461_s24 + $0x370] sm:$0xff]  ;;  %v1186_v15 = vld [vmem:[%s1461_s24 + $0x278] sm:$0xff] }
  0x27   : > { %314 = vmatpush.msra.mxu0 %v243_v46  ;;  %361 = vmatpush.msra.mxu2 %v274_v48  ;;  %v1567_v8 = vld [vmem:[%s1865_s1 + $0x20] sm:$0xff]  ;;  %v1200_v16 = vld [vmem:[%s1461_s24 + $0x2e8] sm:$0xff]  ;;  %v1185_v18 = vld [vmem:[%s1461_s24 + $0x270] sm:$0xff] }
  0x28   : > { %337 = vmatpush.msra.mxu1 %v259_v47  ;;  %384 = vmatpush.msra.mxu3 %v290_v49  ;;  %v237_v10 = vld [vmem:[%s1867_s3] sm:$0xff]  ;;  %v1216_v17 = vld [vmem:[%s1461_s24 + $0x368] sm:$0xff]  ;;  %v1198_v21 = vld [vmem:[%s1461_s24 + $0x2d8] sm:$0xff] }
  0x29   : > { %315 = vmatpush.msra.mxu0 %v242_v50  ;;  %362 = vmatpush.msra.mxu2 %v273_v52  ;;  %v1199_v19 = vld [vmem:[%s1461_s24 + $0x2e0] sm:$0xff]  ;;  %v1184_v28 = vld [vmem:[%s1461_s24 + $0x268] sm:$0xff]  ;;  %v1197_v29 = vld [vmem:[%s1461_s24 + $0x2d0] sm:$0xff] }
  0x2a   : > { %338 = vmatpush.msra.mxu1 %v258_v51  ;;  %385 = vmatpush.msra.mxu3 %v289_v53  ;;  %v1215_v20 = vld [vmem:[%s1461_s24 + $0x360] sm:$0xff]  ;;  %v1214_v30 = vld [vmem:[%s1461_s24 + $0x358] sm:$0xff]  ;;  %v1196_v33 = vld [vmem:[%s1461_s24 + $0x2c8] sm:$0xff] }
  0x2b   : > { %316 = vmatpush.msra.mxu0 %v241_v54  ;;  %363 = vmatpush.msra.mxu2 %v272_v56  ;;  %v1183_v32 = vld [vmem:[%s1461_s24 + $0x260] sm:$0xff]  ;;  %v1213_v34 = vld [vmem:[%s1461_s24 + $0x350] sm:$0xff]  ;;  %v1182_v37 = vld [vmem:[%s1461_s24 + $0x258] sm:$0xff] }
  0x2c   : > { %339 = vmatpush.msra.mxu1 %v257_v55  ;;  %386 = vmatpush.msra.mxu3 %v288_v57  ;;  %v1195_v38 = vld [vmem:[%s1461_s24 + $0x2c0] sm:$0xff]  ;;  %v1212_v39 = vld [vmem:[%s1461_s24 + $0x348] sm:$0xff]  ;;  %v1181_v40 = vld [vmem:[%s1461_s24 + $0x250] sm:$0xff] }
  0x2d   : > { %317 = vmatpush.msra.mxu0 %v240_v58  ;;  %364 = vmatpush.msra.mxu2 %v271_v60  ;;  %v1194_v41 = vld [vmem:[%s1461_s24 + $0x2b8] sm:$0xff]  ;;  %v1211_v42 = vld [vmem:[%s1461_s24 + $0x340] sm:$0xff]  ;;  %v1180_v43 = vld [vmem:[%s1461_s24 + $0x248] sm:$0xff] }
  0x2e   : > { %340 = vmatpush.msra.mxu1 %v256_v59  ;;  %387 = vmatpush.msra.mxu3 %v287_v61  ;;  %v1193_v44 = vld [vmem:[%s1461_s24 + $0x2b0] sm:$0xff]  ;;  %v1210_v45 = vld [vmem:[%s1461_s24 + $0x338] sm:$0xff]  ;;  %v1179_v46 = vld [vmem:[%s1461_s24 + $0x240] sm:$0xff] }
  0x2f   : > { %365 = vmatmul.f32.vlgmr.msra.gmra.mxu2 %v1528_v62  ;;  %388 = vmatmul.f32.vlgmr.msra.gmra.mxu3 %v1533_v63  ;;  %v1192_v47 = vld [vmem:[%s1461_s24 + $0x2a8] sm:$0xff]  ;;  %v1209_v48 = vld [vmem:[%s1461_s24 + $0x330] sm:$0xff]  ;;  %v1178_v50 = vld [vmem:[%s1461_s24 + $0x238] sm:$0xff] }
  0x30   : > { %318 = vmatpush.msra.mxu0 %v239_v0  ;;  %341 = vmatpush.msra.mxu1 %v255_v1  ;;  %v1191_v51 = vld [vmem:[%s1461_s24 + $0x2a0] sm:$0xff]  ;;  %v1208_v52 = vld [vmem:[%s1461_s24 + $0x328] sm:$0xff]  ;;  %v1177_v54 = vld [vmem:[%s1461_s24 + $0x230] sm:$0xff] }
  0x31   : > { %319 = vmatmul.f32.vlgmr.msra.gmra.mxu0 %v1540_v2  ;;  %342 = vmatmul.f32.vlgmr.msra.gmra.mxu1 %v1545_v3  ;;  %v1190_v55 = vld [vmem:[%s1461_s24 + $0x298] sm:$0xff]  ;;  %v1207_v56 = vld [vmem:[%s1461_s24 + $0x320] sm:$0xff]  ;;  %v1176_v59 = vld [vmem:[%s1461_s24 + $0x228] sm:$0xff] }
  0x32   : > { %1384 = vset.pattern.permute.xlu0 %v1416_v5  ;;  %550 = vmatpush.msrb.mxu2 %v1202_v11  ;;  %v1189_v60 = vld [vmem:[%s1461_s24 + $0x290] sm:$0xff]  ;;  %v1206_v61 = vld [vmem:[%s1461_s24 + $0x318] sm:$0xff]  ;;  %v1175_v0 = vld [vmem:[%s1461_s24 + $0x220] sm:$0xff] }
  0x33   : > { %397 = vperm.xlu0 %1384, %v236_v4   ;;  %573 = vmatpush.msrb.mxu3 %v1218_v13  ;;  %v1188_v1 = vld [vmem:[%s1461_s24 + $0x288] sm:$0xff]  ;;  %v1205_v4 = vld [vmem:[%s1461_s24 + $0x310] sm:$0xff]  ;;  %v1174_v11 = vld [vmem:[%s1461_s24 + $0x218] sm:$0xff] }
  0x34   : > { %527 = vmatpush.msrb.mxu1 %v1186_v15  ;;  %551 = vmatpush.msrb.mxu2 %v1201_v12  ;;  %v1187_v12 = vld [vmem:[%s1461_s24 + $0x280] sm:$0xff]  ;;  %v1204_v13 = vld [vmem:[%s1461_s24 + $0x308] sm:$0xff] }
  0x35   : > { %574 = vmatpush.msrb.mxu3 %v1217_v14 }
  0x36   : > { %528 = vmatpush.msrb.mxu1 %v1185_v18  ;;  %552 = vmatpush.msrb.mxu2 %v1200_v16  ;;  %v1173_v16 = vld [vmem:[%s1461_s24 + $0x210] sm:$0xff] }
  0x37   : > { %368 = vmatmul.f32.gmra.mxu2 %v1557_v6  ;;  %391 = vmatmul.f32.gmra.mxu3 %v1562_v7 }
  0x38   : > { %575 = vmatpush.msrb.mxu3 %v1216_v17  ;;  %553 = vmatpush.msrb.mxu2 %v1199_v19  ;;  %v1203_v17 = vld [vmem:[%s1461_s24 + $0x300] sm:$0xff] }
  0x39   : > { %322 = vmatmul.f32.gmra.mxu0 %v1567_v8  ;;  %345 = vmatmul.f32.gmra.mxu1 %v1572_v9 }
  0x3a   : > { %576 = vmatpush.msrb.mxu3 %v1215_v20  ;;  %554 = vmatpush.msrb.mxu2 %v1198_v21  ;;  %v1172_v21 = vld [vmem:[%s1461_s24 + $0x208] sm:$0xff] }
  0x3b   : > { %426 = vperm.xlu0 %1384, %v237_v10   ;;  %529 = vmatpush.msrb.mxu1 %v1184_v28 }
  0x3c   : > { %555 = vmatpush.msrb.mxu2 %v1197_v29  ;;  %577 = vmatpush.msrb.mxu3 %v1214_v30 }
  0x3d   : > { %530 = vmatpush.msrb.mxu1 %v1183_v32 }
  0x3e   : > { %556 = vmatpush.msrb.mxu2 %v1196_v33  ;;  %578 = vmatpush.msrb.mxu3 %v1213_v34  ;;  %v1233_v34 = vld [vmem:[%s1461_s24 + $0x3f0] sm:$0xff] }
  0x3f   : > { %531 = vmatpush.msrb.mxu1 %v1182_v37  ;;  %v1230_v37 = vld [vmem:[%s1461_s24 + $0x3d8] sm:$0xff] }
  0x40   : > { %557 = vmatpush.msrb.mxu2 %v1195_v38  ;;  %579 = vmatpush.msrb.mxu3 %v1212_v39  ;;  %v1229_v38 = vld [vmem:[%s1461_s24 + $0x3d0] sm:$0xff]  ;;  %v1228_v39 = vld [vmem:[%s1461_s24 + $0x3c8] sm:$0xff] }
  0x41   : > { %532 = vmatpush.msrb.mxu1 %v1181_v40  ;;  %v1227_v40 = vld [vmem:[%s1461_s24 + $0x3c0] sm:$0xff] }
  0x42   : > { %558 = vmatpush.msrb.mxu2 %v1194_v41  ;;  %580 = vmatpush.msrb.mxu3 %v1211_v42  ;;  %v1226_v41 = vld [vmem:[%s1461_s24 + $0x3b8] sm:$0xff]  ;;  %v1225_v42 = vld [vmem:[%s1461_s24 + $0x3b0] sm:$0xff] }
  0x43   : > { %533 = vmatpush.msrb.mxu1 %v1180_v43  ;;  %v1224_v43 = vld [vmem:[%s1461_s24 + $0x3a8] sm:$0xff] }
  0x44   : > { %559 = vmatpush.msrb.mxu2 %v1193_v44  ;;  %581 = vmatpush.msrb.mxu3 %v1210_v45  ;;  %v1223_v44 = vld [vmem:[%s1461_s24 + $0x3a0] sm:$0xff]  ;;  %v1222_v45 = vld [vmem:[%s1461_s24 + $0x398] sm:$0xff] }
  0x45   : > { %534 = vmatpush.msrb.mxu1 %v1179_v46  ;;  %v1221_v46 = vld [vmem:[%s1461_s24 + $0x390] sm:$0xff] }
  0x46   : > { %560 = vmatpush.msrb.mxu2 %v1192_v47  ;;  %582 = vmatpush.msrb.mxu3 %v1209_v48  ;;  %v1220_v47 = vld [vmem:[%s1461_s24 + $0x388] sm:$0xff]  ;;  %v1219_v48 = vld [vmem:[%s1461_s24 + $0x380] sm:$0xff] }
  0x47   : > { %535 = vmatpush.msrb.mxu1 %v1178_v50 }
  0x48   : > { %561 = vmatpush.msrb.mxu2 %v1191_v51  ;;  %583 = vmatpush.msrb.mxu3 %v1208_v52  ;;  %v1664_v51 = vld [vmem:[%s1868_s4] sm:$0xff] }
  0x49   : > { %536 = vmatpush.msrb.mxu1 %v1177_v54 }
  0x4a   : > { %562 = vmatpush.msrb.mxu2 %v1190_v55  ;;  %584 = vmatpush.msrb.mxu3 %v1207_v56  ;;  %v1253_v55 = vld [vmem:[%s1461_s24 + $0x478] sm:$0xff] }
  0x4b   : > { %537 = vmatpush.msrb.mxu1 %v1176_v59  ;;  %v1269_v56 = vld [vmem:[%s1461_s24 + $0x4f8] sm:$0xff]  ;;  %v1251_v59 = vld [vmem:[%s1461_s24 + $0x468] sm:$0xff] }
  0x4c   : > { %563 = vmatpush.msrb.mxu2 %v1189_v60  ;;  %585 = vmatpush.msrb.mxu3 %v1206_v61  ;;  %v1267_v60 = vld [vmem:[%s1461_s24 + $0x4e8] sm:$0xff]  ;;  %v1285_v61 = vld [vmem:[%s1461_s24 + $0x578] sm:$0xff] }
  0x4d   : > { %538 = vmatpush.msrb.mxu1 %v1175_v0  ;;  %v1250_v0 = vld [vmem:[%s1461_s24 + $0x460] sm:$0xff] }
  0x4e   : > { %564 = vmatpush.msrb.mxu2 %v1188_v1  ;;  %586 = vmatpush.msrb.mxu3 %v1205_v4  ;;  %v1266_v1 = vld [vmem:[%s1461_s24 + $0x4e0] sm:$0xff]  ;;  %v1249_v4 = vld [vmem:[%s1461_s24 + $0x458] sm:$0xff] }
  0x4f   : > { %539 = vmatpush.msrb.mxu1 %v1174_v11 }
  0x50   : > { %565 = vmatpush.msrb.mxu2 %v1187_v12  ;;  %587 = vmatpush.msrb.mxu3 %v1204_v13 }
  0x51   : > { %566 = vmatmul.f32.vlgmr.msrb.gmra.mxu2 %v1545_v3  ;;  %540 = vmatpush.msrb.mxu1 %v1173_v16  ;;  %v1264_v16 = vld [vmem:[%s1461_s24 + $0x4d0] sm:$0xff] }
  0x52   : > { %588 = vmatpush.msrb.mxu3 %v1203_v17  ;;  %739 = vmatpush.msra.mxu2 %v1253_v55  ;;  %v1284_v17 = vld [vmem:[%s1461_s24 + $0x570] sm:$0xff]  ;;  %v1275_v55 = vld [vmem:[%s1461_s24 + $0x528] sm:$0xff] }
  0x53   : > { %589 = vmatmul.f32.vlgmr.msrb.gmra.mxu3 %v1528_v62  ;;  %541 = vmatpush.msrb.mxu1 %v1172_v21  ;;  %v1263_v21 = vld [vmem:[%s1461_s24 + $0x4c8] sm:$0xff] }
  0x54   : > { %762 = vmatpush.msra.mxu3 %v1269_v56  ;;  %v1238_v56 = vld [vmem:[%s1461_s24 + $0x400] sm:$0xff] }
  0x59   : > { %569 = vmatmul.f32.gmra.mxu2 %v1572_v9 }
  0x5b   : > { %592 = vmatmul.f32.gmra.mxu3 %v1557_v6 }
  0xae   : > { %v320_v22 = vpop.f32.mrf.mxu0  ;;  %v343_v23 = vpop.f32.mrf.mxu1 }
  0xaf   : > { %v344_v24 = vadd.f32 %v343_v23, %v320_v22 }
  0xb2   : > { %v366_v25 = vpop.f32.mrf.mxu2  ;;  %v389_v26 = vpop.f32.mrf.mxu3 }
  0xb3   : > { %v367_v27 = vadd.f32 %v366_v25, %v344_v24  ;;  %v1171_v25 = vld [vmem:[%s1461_s24 + $0x200] sm:$0xff] }
  0xb4   : > { %542 = vmatpush.msrb.mxu1 %v1171_v25  ;;  %v1246_v25 = vld [vmem:[%s1461_s24 + $0x440] sm:$0xff] }
  0xb5   : > { %v390_v31 = vadd.f32 %v389_v26, %v367_v27  ;;  %v1632_v27 = vpop.permute.xlu0 %397  ;;  %543 = vmatmul.f32.vlgmr.msrb.gmra.mxu1 %v1540_v2 }
  0xb6   : > { %v323_v57 = vpop.f32.mrf.mxu0  ;;  %v346_v58 = vpop.f32.mrf.mxu1 }
  0xb7   : > { %v1168_v35 = vmul.f32 -1.442695, %v390_v31  ;;  %v421_v36 = vsel %vm420_vm0, %v390_v31, -inf  ;;  %v347_v5 = vadd.f32 %v346_v58, %v323_v57  ;;  %v1234_v31 = vld [vmem:[%s1461_s24 + $0x3f8] sm:$0xff]  ;;  %v1252_v57 = vld [vmem:[%s1461_s24 + $0x470] sm:$0xff] }
  0xb8   : > { %422 = vmax.xlane.f32.xlu1 %v421_v36  ;;  %v1231_v36 = vld [vmem:[%s1461_s24 + $0x3e0] sm:$0xff]  ;;  %v1268_v58 = vld [vmem:[%s1461_s24 + $0x4f0] sm:$0xff]  ;;  %740 = vmatpush.msra.mxu2 %v1252_v57 }
  0xb9   : > { %1385 = vpow2.f32 %v1168_v35  ;;  %v1232_v35 = vld [vmem:[%s1461_s24 + $0x3e8] sm:$0xff]  ;;  %763 = vmatpush.msra.mxu3 %v1268_v58  ;;  %v1254_v57 = vld [vmem:[%s1461_s24 + $0x480] sm:$0xff] }
  0xba   : > { %v369_v10 = vpop.f32.mrf.mxu2  ;;  %v392_v19 = vpop.f32.mrf.mxu3  ;;  %741 = vmatpush.msra.mxu2 %v1251_v59  ;;  %v1274_v58 = vld [vmem:[%s1461_s24 + $0x520] sm:$0xff] }
  0xbb   : > { %v370_v18 = vadd.f32 %v369_v10, %v347_v5  ;;  %764 = vmatpush.msra.mxu3 %v1267_v60  ;;  %v1265_v5 = vld [vmem:[%s1461_s24 + $0x4d8] sm:$0xff] }
  0xbc   : > { %742 = vmatpush.msra.mxu2 %v1250_v0 }
  0xbd   : > { %v393_v26 = vadd.f32 %v392_v19, %v370_v18  ;;  %546 = vmatmul.f32.gmra.mxu1 %v1567_v8  ;;  %765 = vmatpush.msra.mxu3 %v1266_v1  ;;  %v1273_v1 = vld [vmem:[%s1461_s24 + $0x518] sm:$0xff] }
  0xbe   : > { %743 = vmatpush.msra.mxu2 %v1249_v4 }
  0xbf   : > { %v1386_v49 = vpop.eup %1385  ;;  %v400_v32 = vadd.f32 %v1632_v27, %v393_v26  ;;  %766 = vmatpush.msra.mxu3 %v1265_v5  ;;  %v1262_v26 = vld [vmem:[%s1461_s24 + $0x4c0] sm:$0xff]  ;;  %v1272_v5 = vld [vmem:[%s1461_s24 + $0x510] sm:$0xff] }
  0xc0   : > { %v404_v53 = vadd.f32 1.0, %v1386_v49  ;;  %v1659_v49 = vpop.permute.xlu0 %426 }
  0xc1   : > { %767 = vmatpush.msra.mxu3 %v1264_v16 }
  0xc2   : > { %1387 = vrcp.f32 %v404_v53  ;;  %v416_v22 = vand.u32 2147483648, %v404_v53  ;;  %v414_v24 = vand.u32 2147483647, %v404_v53  ;;  %vm410_vm2 = vweird.f32 %v404_v53 }
  0xc3   : > { %768 = vmatpush.msra.mxu3 %v1263_v21 }
  0xc4   : > { %v417_v29 = vor.u32 1.1754944e-38, %v416_v22  ;;  %vm415_vm4 = vcmp.eq.f32.partialorder %v414_v24, 8.507059e+37  ;;  %v1283_v22 = vld [vmem:[%s1461_s24 + $0x568] sm:$0xff] }
  0xc5   : > { %769 = vmatpush.msra.mxu3 %v1262_v26  ;;  %v1294_v26 = vld [vmem:[%s1461_s24 + $0x5c0] sm:$0xff] }
  0xc8   : > { %v1388_v14 = vpop.eup %1387 }
  0xc9   : > { %v406_v15 = vmul.f32 %v1388_v14, %v404_v53  ;;  %vm411_vm1 = vweird.f32 %v1388_v14 }
  0xca   : > { %vm412_vm3 = vmor %vm410_vm2, %vm411_vm1 }
  0xcb   : > { %v407_v20 = vsub.f32 1.0, %v406_v15  ;;  %v1248_v15 = vld [vmem:[%s1461_s24 + $0x450] sm:$0xff] }
  0xcc   : > { %744 = vmatpush.msra.mxu2 %v1248_v15  ;;  %v1271_v15 = vld [vmem:[%s1461_s24 + $0x508] sm:$0xff] }
  0xcd   : > { %v408_v23 = vmul.f32 %v1388_v14, %v407_v20  ;;  %v1247_v20 = vld [vmem:[%s1461_s24 + $0x448] sm:$0xff] }
  0xce   : > { %745 = vmatpush.msra.mxu2 %v1247_v20  ;;  %v1301_v20 = vld [vmem:[%s1461_s24 + $0x5f8] sm:$0xff] }
  0xcf   : > { %v409_v28 = vadd.f32 %v1388_v14, %v408_v23 }
  0xd0   : > { %746 = vmatpush.msra.mxu2 %v1246_v25  ;;  %v1295_v25 = vld [vmem:[%s1461_s24 + $0x5c8] sm:$0xff] }
  0xd1   : > { %v413_v30 = vsel %vm412_vm3, %v1388_v14, %v409_v28  ;;  %v1282_v28 = vld [vmem:[%s1461_s24 + $0x560] sm:$0xff]  ;;  %vm1100_vm3 = vcmask 15360  }
  0xd2   : > { %v418_v33 = vsel %vm415_vm4, %v417_v29, %v413_v30  ;;  %v1245_v29 = vld [vmem:[%s1461_s24 + $0x438] sm:$0xff]  ;;  %vm1102_vm4 = vcmask 23552  }
  0xd3   : > { %1169 = vmatpush.xpose.msk.msrb.mxu0 %vm420_vm0, %v418_v33  ;;  %v1261_v30 = vld [vmem:[%s1461_s24 + $0x4b8] sm:$0xff]  ;;  %747 = vmatpush.msra.mxu2 %v1245_v29  ;;  %v1260_v33 = vld [vmem:[%s1461_s24 + $0x4b0] sm:$0xff] }
  0xd4   : > { %v567_v11 = vpop.f32.mrf.mxu2  ;;  %770 = vmatpush.msra.mxu3 %v1261_v30  ;;  %v1292_v29 = vld [vmem:[%s1461_s24 + $0x5b0] sm:$0xff]  ;;  %v1291_v30 = vld [vmem:[%s1461_s24 + $0x5a8] sm:$0xff] }
  0xd6   : > { %1170 = vmatmul.msk.f32.vlgmr.msrb.gmra.mxu0 %vm420_vm0, %v400_v32  ;;  %v590_v13 = vpop.f32.mrf.mxu3  ;;  %v1244_v32 = vld [vmem:[%s1461_s24 + $0x430] sm:$0xff]  ;;  %771 = vmatpush.msra.mxu3 %v1260_v33  ;;  %v1287_v33 = vld [vmem:[%s1461_s24 + $0x588] sm:$0xff] }
  0xd7   : > { %596 = vmatpush.msra.mxu0 %v1234_v31  ;;  %v1281_v31 = vld [vmem:[%s1461_s24 + $0x558] sm:$0xff]  ;;  %748 = vmatpush.msra.mxu2 %v1244_v32 }
  0xd8   : > { %v1289_v32 = vld [vmem:[%s1461_s24 + $0x598] sm:$0xff] }
  0xd9   : > { %597 = vmatpush.msra.mxu0 %v1233_v34  ;;  %v1280_v34 = vld [vmem:[%s1461_s24 + $0x550] sm:$0xff] }
  0xdb   : > { %598 = vmatpush.msra.mxu0 %v1232_v35  ;;  %v1243_v35 = vld [vmem:[%s1461_s24 + $0x428] sm:$0xff] }
  0xdc   : > { %749 = vmatpush.msra.mxu2 %v1243_v35 }
  0xdd   : > { %599 = vmatpush.msra.mxu0 %v1231_v36  ;;  %v1259_v36 = vld [vmem:[%s1461_s24 + $0x4a8] sm:$0xff] }
  0xde   : > { %772 = vmatpush.msra.mxu3 %v1259_v36 }
  0xdf   : > { %600 = vmatpush.msra.mxu0 %v1230_v37  ;;  %v1279_v37 = vld [vmem:[%s1461_s24 + $0x548] sm:$0xff] }
  0xe1   : > { %601 = vmatpush.msra.mxu0 %v1229_v38 }
  0xe3   : > { %602 = vmatpush.msra.mxu0 %v1228_v39  ;;  %v1242_v39 = vld [vmem:[%s1461_s24 + $0x420] sm:$0xff] }
  0xe4   : > { %750 = vmatpush.msra.mxu2 %v1242_v39  ;;  %v1320_v39 = vld [vmem:[%s1461_s24 + $0x678] sm:$0xff] }
  0xe5   : > { %603 = vmatpush.msra.mxu0 %v1227_v40  ;;  %v1258_v40 = vld [vmem:[%s1461_s24 + $0x4a0] sm:$0xff] }
  0xe6   : > { %773 = vmatpush.msra.mxu3 %v1258_v40  ;;  %v1319_v40 = vld [vmem:[%s1461_s24 + $0x670] sm:$0xff] }
  0xe7   : > { %604 = vmatpush.msra.mxu0 %v1226_v41  ;;  %v1278_v41 = vld [vmem:[%s1461_s24 + $0x540] sm:$0xff] }
  0xe9   : > { %605 = vmatpush.msra.mxu0 %v1225_v42 }
  0xeb   : > { %606 = vmatpush.msra.mxu0 %v1224_v43  ;;  %v1241_v43 = vld [vmem:[%s1461_s24 + $0x418] sm:$0xff] }
  0xec   : > { %751 = vmatpush.msra.mxu2 %v1241_v43 }
  0xed   : > { %607 = vmatpush.msra.mxu0 %v1223_v44  ;;  %v1257_v44 = vld [vmem:[%s1461_s24 + $0x498] sm:$0xff] }
  0xee   : > { %774 = vmatpush.msra.mxu3 %v1257_v44  ;;  %v1318_v44 = vld [vmem:[%s1461_s24 + $0x668] sm:$0xff] }
  0xef   : > { %608 = vmatpush.msra.mxu0 %v1222_v45  ;;  %v1277_v45 = vld [vmem:[%s1461_s24 + $0x538] sm:$0xff] }
  0xf1   : > { %609 = vmatpush.msra.mxu0 %v1221_v46  ;;  %v1240_v46 = vld [vmem:[%s1461_s24 + $0x410] sm:$0xff] }
  0xf2   : > { %752 = vmatpush.msra.mxu2 %v1240_v46 }
  0xf3   : > { %610 = vmatpush.msra.mxu0 %v1220_v47  ;;  %v1256_v47 = vld [vmem:[%s1461_s24 + $0x490] sm:$0xff] }
  0xf4   : > { %775 = vmatpush.msra.mxu3 %v1256_v47  ;;  %v1317_v47 = vld [vmem:[%s1461_s24 + $0x660] sm:$0xff] }
  0xf5   : > { %611 = vmatpush.msra.mxu0 %v1219_v48  ;;  %v1276_v48 = vld [vmem:[%s1461_s24 + $0x530] sm:$0xff] }
  0xf6   : > { %612 = vmatmul.f32.vlgmr.msra.gmra.mxu0 %v1533_v63 }
  0xf7   : > { %785 = vmatpush.msrb.mxu0 %v1285_v61  ;;  %v593_v61 = vpop.f32.mrf.mxu3 }
  0xf9   : > { %786 = vmatpush.msrb.mxu0 %v1284_v17  ;;  %v1270_v17 = vld [vmem:[%s1461_s24 + $0x500] sm:$0xff] }
  0xfb   : > { %787 = vmatpush.msrb.mxu0 %v1283_v22 }
  0xfd   : > { %788 = vmatpush.msrb.mxu0 %v1282_v28  ;;  %v1293_v28 = vld [vmem:[%s1461_s24 + $0x5b8] sm:$0xff] }
  0xfe   : > { %615 = vmatmul.f32.gmra.mxu0 %v1562_v7 }
  0xff   : > { %789 = vmatpush.msrb.mxu0 %v1281_v31  ;;  %v1290_v31 = vld [vmem:[%s1461_s24 + $0x5a0] sm:$0xff] }
 0x101   : > { %790 = vmatpush.msrb.mxu0 %v1280_v34  ;;  %v1286_v34 = vld [vmem:[%s1461_s24 + $0x580] sm:$0xff] }
 0x103   : > { %791 = vmatpush.msrb.mxu0 %v1279_v37 }
 0x105   : > { %792 = vmatpush.msrb.mxu0 %v1278_v41 }
 0x107   : > { %793 = vmatpush.msrb.mxu0 %v1277_v45 }
 0x109   : > { %794 = vmatpush.msrb.mxu0 %v1276_v48  ;;  %v1336_v48 = vld [vmem:[%s1461_s24 + $0x6f8] sm:$0xff] }
 0x10b   : > { %795 = vmatpush.msrb.mxu0 %v1275_v55  ;;  %v1352_v55 = vld [vmem:[%s1461_s24 + $0x778] sm:$0xff] }
 0x10d   : > { %796 = vmatpush.msrb.mxu0 %v1274_v58  ;;  %v1351_v58 = vld [vmem:[%s1461_s24 + $0x770] sm:$0xff] }
 0x10f   : > { %797 = vmatpush.msrb.mxu0 %v1273_v1  ;;  %v1332_v1 = vld [vmem:[%s1461_s24 + $0x6d8] sm:$0xff] }
 0x111   : > { %798 = vmatpush.msrb.mxu0 %v1272_v5 }
 0x113   : > { %799 = vmatpush.msrb.mxu0 %v1271_v15  ;;  %v1330_v15 = vld [vmem:[%s1461_s24 + $0x6c8] sm:$0xff] }
 0x115   : > { %800 = vmatpush.msrb.mxu0 %v1270_v17  ;;  %v1310_v17 = vld [vmem:[%s1461_s24 + $0x628] sm:$0xff] }
 0x116   : > { %801 = vmatmul.f32.vlgmr.msrb.gmra.mxu0 %v1528_v62  ;;  %v1296_v62 = vld [vmem:[%s1461_s24 + $0x5d0] sm:$0xff] }
 0x117   : > { %974 = vmatpush.msra.mxu0 %v1336_v48  ;;  %v1322_v48 = vld [vmem:[%s1461_s24 + $0x688] sm:$0xff] }
 0x11e   : > { %804 = vmatmul.f32.gmra.mxu0 %v1557_v6  ;;  %v1288_v6 = vld [vmem:[%s1461_s24 + $0x590] sm:$0xff] }
 0x132   : > { %v544_v10 = vpop.f32.mrf.mxu1 }
 0x133   : > { %v568_v12 = vadd.f32 %v567_v11, %v544_v10 }
 0x135   : > { %v591_v14 = vadd.f32 %v590_v13, %v568_v12 }
 0x153   : > { %v452_v50 = vpop.f32.mrf.mxu0 }
 0x154   : > { %v453_v52 = vadd.f32 %v452_v50, %v1659_v49  ;;  %v547_v50 = vpop.f32.mrf.mxu1 }
 0x156   : > { %v455_v53 = vmul.f32 %v453_v52, %v1664_v51  ;;  %v570_v52 = vpop.f32.mrf.mxu2 }
 0x157   : > { %v571_v60 = vadd.f32 %v570_v52, %v547_v50 }
 0x158   : > { %v457_v54 = vsel %vm456_vm5, %v455_v53, 0.0  ;;  %v1239_v53 = vld [vmem:[%s1461_s24 + $0x408] sm:$0xff] }
 0x159   : > { %458 = vadd.xlane.f32.xlu1 %v457_v54  ;;  %v1255_v54 = vld [vmem:[%s1461_s24 + $0x488] sm:$0xff]  ;;  %753 = vmatpush.msra.mxu2 %v1239_v53  ;;  %v594_v10 = vadd.f32 %v593_v61, %v571_v60  ;;  %v1316_v53 = vld [vmem:[%s1461_s24 + $0x658] sm:$0xff]  ;;  %v1333_v60 = vld [vmem:[%s1461_s24 + $0x6e0] sm:$0xff] }
 0x15a   : > { %776 = vmatpush.msra.mxu3 %v1255_v54  ;;  %v1335_v54 = vld [vmem:[%s1461_s24 + $0x6f0] sm:$0xff]  ;;  %v1350_v61 = vld [vmem:[%s1461_s24 + $0x768] sm:$0xff] }
 0x15b   : > { %754 = vmatpush.msra.mxu2 %v1238_v56  ;;  %975 = vmatpush.msra.mxu0 %v1335_v54  ;;  %v1315_v56 = vld [vmem:[%s1461_s24 + $0x650] sm:$0xff] }
 0x15c   : > { %777 = vmatpush.msra.mxu3 %v1254_v57  ;;  %755 = vmatmul.f32.vlgmr.msra.gmra.mxu2 %v1540_v2  ;;  %v1334_v57 = vld [vmem:[%s1461_s24 + $0x6e8] sm:$0xff]  ;;  %v1367_v54 = vld [vmem:[%s1461_s24 + $0x7f0] sm:$0xff] }
 0x15d   : > { %778 = vmatmul.f32.vlgmr.msra.gmra.mxu3 %v1545_v3  ;;  %976 = vmatpush.msra.mxu0 %v1334_v57  ;;  %v1366_v57 = vld [vmem:[%s1461_s24 + $0x7e8] sm:$0xff] }
 0x15e   : > { %951 = vmatpush.msrb.mxu3 %v1320_v39 }
 0x15f   : > { %977 = vmatpush.msra.mxu0 %v1333_v60  ;;  %v1402_v60 = vld [vmem:[%s1865_s1 + $0x20] sm:$0xff] }
 0x160   : > { %952 = vmatpush.msrb.mxu3 %v1319_v40  ;;  %v1305_v40 = vld [vmem:[%s1461_s24 + $0x600] sm:$0xff] }
 0x161   : > { %978 = vmatpush.msra.mxu0 %v1332_v1  ;;  %v1363_v1 = vld [vmem:[%s1461_s24 + $0x7d0] sm:$0xff] }
 0x162   : > { %953 = vmatpush.msrb.mxu3 %v1318_v44 }
 0x164   : > { %758 = vmatmul.f32.gmra.mxu2 %v1567_v8  ;;  %v1298_v8 = vld [vmem:[%s1461_s24 + $0x5e0] sm:$0xff]  ;;  %954 = vmatpush.msrb.mxu3 %v1317_v47  ;;  %v1368_v47 = vld [vmem:[%s1461_s24 + $0x7f8] sm:$0xff] }
 0x165   : > { %781 = vmatmul.f32.gmra.mxu3 %v1572_v9  ;;  %v1297_v9 = vld [vmem:[%s1461_s24 + $0x5d8] sm:$0xff] }
 0x166   : > { %955 = vmatpush.msrb.mxu3 %v1316_v53 }
 0x168   : > { %956 = vmatpush.msrb.mxu3 %v1315_v56  ;;  %v1337_v56 = vld [vmem:[%s1461_s24 + $0x700] sm:$0xff] }
 0x173   : > { %v613_v18 = vpop.f32.mrf.mxu0 }
 0x174   : > { %v614_v19 = vadd.f32 %v613_v18, %v591_v14 }
 0x176   : > { %v1235_v23 = vmul.f32 -1.442695, %v614_v19  ;;  %v639_v24 = vsel %vm420_vm0, %v614_v19, -inf }
 0x177   : > { %640 = vmax.xlane.f32.xlu2 %v639_v24  ;;  %v1299_v24 = vld [vmem:[%s1461_s24 + $0x5e8] sm:$0xff] }
 0x178   : > { %1389 = vpow2.f32 %v1235_v23  ;;  %v1300_v23 = vld [vmem:[%s1461_s24 + $0x5f0] sm:$0xff] }
 0x17b   : > { %v616_v12 = vpop.f32.mrf.mxu0 }
 0x17c   : > { %v617_v18 = vadd.f32 %v616_v12, %v594_v10  ;;  %v1312_v10 = vld [vmem:[%s1461_s24 + $0x638] sm:$0xff] }
 0x17d   : > { %v1348_v12 = vld [vmem:[%s1461_s24 + $0x758] sm:$0xff] }
 0x17e   : > { %v1390_v38 = vpop.eup %1389  ;;  %v619_v22 = vadd.f32 %v617_v18, %v1632_v27  ;;  %v1329_v18 = vld [vmem:[%s1461_s24 + $0x6c0] sm:$0xff] }
 0x17f   : > { %v623_v42 = vadd.f32 1.0, %v1390_v38 }
 0x181   : > { %1391 = vrcp.f32 %v623_v42  ;;  %v635_v11 = vand.u32 2147483648, %v623_v42  ;;  %v633_v14 = vand.u32 2147483647, %v623_v42  ;;  %vm629_vm7 = vweird.f32 %v623_v42 }
 0x183   : > { %v636_v3 = vor.u32 1.1754944e-38, %v635_v11  ;;  %vm634_vm9 = vcmp.eq.f32.partialorder %v633_v14, 8.507059e+37  ;;  %v1331_v11 = vld [vmem:[%s1461_s24 + $0x6d0] sm:$0xff] }
 0x184   : > { %979 = vmatpush.msra.mxu0 %v1331_v11  ;;  %v1311_v14 = vld [vmem:[%s1461_s24 + $0x630] sm:$0xff] }
 0x185   : > { %v1405_v11 = vld [vmem:[%s1865_s1 + $0x30] sm:$0xff] }
 0x186   : > { %980 = vmatpush.msra.mxu0 %v1330_v15  ;;  %v1357_v15 = vld [vmem:[%s1461_s24 + $0x7a0] sm:$0xff] }
 0x187   : > { %v1392_v59 = vpop.eup %1391 }
 0x188   : > { %v625_v0 = vmul.f32 %v1392_v59, %v623_v42  ;;  %vm630_vm6 = vweird.f32 %v1392_v59  ;;  %981 = vmatpush.msra.mxu0 %v1329_v18  ;;  %v1354_v18 = vld [vmem:[%s1461_s24 + $0x788] sm:$0xff] }
 0x189   : > { %vm631_vm8 = vmor %vm629_vm7, %vm630_vm6 }
 0x18a   : > { %v626_v4 = vsub.f32 1.0, %v625_v0  ;;  %v1313_v0 = vld [vmem:[%s1461_s24 + $0x640] sm:$0xff] }
 0x18c   : > { %v627_v13 = vmul.f32 %v1392_v59, %v626_v4  ;;  %v1349_v4 = vld [vmem:[%s1461_s24 + $0x760] sm:$0xff] }
 0x18e   : > { %v628_v16 = vadd.f32 %v1392_v59, %v627_v13 }
 0x190   : > { %v632_v19 = vsel %vm631_vm8, %v1392_v59, %v628_v16  ;;  %v1314_v59 = vld [vmem:[%s1461_s24 + $0x648] sm:$0xff]  ;;  %v1347_v16 = vld [vmem:[%s1461_s24 + $0x750] sm:$0xff] }
 0x191   : > { %v637_v21 = vsel %vm634_vm9, %v636_v3, %v632_v19  ;;  %957 = vmatpush.msrb.mxu3 %v1314_v59  ;;  %v1346_v3 = vld [vmem:[%s1461_s24 + $0x748] sm:$0xff]  ;;  %v1365_v59 = vld [vmem:[%s1461_s24 + $0x7e0] sm:$0xff] }
 0x192   : > { %1236 = vmatpush.xpose.msk.msra.mxu1 %vm420_vm0, %v637_v21  ;;  %v1309_v21 = vld [vmem:[%s1461_s24 + $0x620] sm:$0xff] }
 0x193   : > { %v802_v42 = vpop.f32.mrf.mxu0  ;;  %958 = vmatpush.msrb.mxu3 %v1313_v0  ;;  %v1364_v0 = vld [vmem:[%s1461_s24 + $0x7d8] sm:$0xff] }
 0x195   : > { %1237 = vmatmul.msk.f32.vlgmr.msra.gmra.mxu1 %vm420_vm0, %v619_v22  ;;  %959 = vmatpush.msrb.mxu3 %v1312_v10  ;;  %v1328_v22 = vld [vmem:[%s1461_s24 + $0x6b8] sm:$0xff]  ;;  %v1361_v10 = vld [vmem:[%s1461_s24 + $0x7c0] sm:$0xff] }
 0x196   : > { %808 = vmatpush.msrb.mxu1 %v1301_v20  ;;  %982 = vmatpush.msra.mxu0 %v1328_v22 }
 0x197   : > { %960 = vmatpush.msrb.mxu3 %v1311_v14  ;;  %v1358_v14 = vld [vmem:[%s1461_s24 + $0x7a8] sm:$0xff] }
 0x198   : > { %809 = vmatpush.msrb.mxu1 %v1300_v23  ;;  %v1345_v23 = vld [vmem:[%s1461_s24 + $0x740] sm:$0xff] }
 0x199   : > { %961 = vmatpush.msrb.mxu3 %v1310_v17  ;;  %v1355_v17 = vld [vmem:[%s1461_s24 + $0x790] sm:$0xff] }
 0x19a   : > { %810 = vmatpush.msrb.mxu1 %v1299_v24  ;;  %v1308_v24 = vld [vmem:[%s1461_s24 + $0x618] sm:$0xff] }
 0x19b   : > { %962 = vmatpush.msrb.mxu3 %v1309_v21 }
 0x19c   : > { %811 = vmatpush.msrb.mxu1 %v1298_v8  ;;  %v1327_v8 = vld [vmem:[%s1461_s24 + $0x6b0] sm:$0xff] }
 0x19d   : > { %963 = vmatpush.msrb.mxu3 %v1308_v24  ;;  %983 = vmatpush.msra.mxu0 %v1327_v8 }
 0x19e   : > { %812 = vmatpush.msrb.mxu1 %v1297_v9  ;;  %v1344_v9 = vld [vmem:[%s1461_s24 + $0x738] sm:$0xff] }
 0x1a0   : > { %813 = vmatpush.msrb.mxu1 %v1296_v62 }
 0x1a2   : > { %814 = vmatpush.msrb.mxu1 %v1295_v25 }
 0x1a4   : > { %815 = vmatpush.msrb.mxu1 %v1294_v26  ;;  %v805_v26 = vpop.f32.mrf.mxu0 }
 0x1a6   : > { %816 = vmatpush.msrb.mxu1 %v1293_v28 }
 0x1a8   : > { %817 = vmatpush.msrb.mxu1 %v1292_v29  ;;  %v1307_v29 = vld [vmem:[%s1461_s24 + $0x610] sm:$0xff] }
 0x1a9   : > { %964 = vmatpush.msrb.mxu3 %v1307_v29 }
 0x1aa   : > { %818 = vmatpush.msrb.mxu1 %v1291_v30  ;;  %v1326_v30 = vld [vmem:[%s1461_s24 + $0x6a8] sm:$0xff] }
 0x1ab   : > { %984 = vmatpush.msra.mxu0 %v1326_v30 }
 0x1ac   : > { %819 = vmatpush.msrb.mxu1 %v1290_v31  ;;  %v1343_v31 = vld [vmem:[%s1461_s24 + $0x730] sm:$0xff] }
 0x1ae   : > { %820 = vmatpush.msrb.mxu1 %v1289_v32 }
 0x1b0   : > { %821 = vmatpush.msrb.mxu1 %v1288_v6  ;;  %v1306_v6 = vld [vmem:[%s1461_s24 + $0x608] sm:$0xff] }
 0x1b1   : > { %965 = vmatpush.msrb.mxu3 %v1306_v6 }
 0x1b2   : > { %822 = vmatpush.msrb.mxu1 %v1287_v33  ;;  %v1325_v33 = vld [vmem:[%s1461_s24 + $0x6a0] sm:$0xff] }
 0x1b3   : > { %985 = vmatpush.msra.mxu0 %v1325_v33  ;;  %966 = vmatpush.msrb.mxu3 %v1305_v40 }
 0x1b4   : > { %823 = vmatpush.msrb.mxu1 %v1286_v34  ;;  %v1342_v34 = vld [vmem:[%s1461_s24 + $0x728] sm:$0xff]  ;;  %967 = vmatmul.f32.vlgmr.msrb.gmra.mxu3 %v1540_v2  ;;  %v1321_v2 = vld [vmem:[%s1461_s24 + $0x680] sm:$0xff] }
 0x1b5   : > { %824 = vmatmul.f32.vlgmr.msrb.gmra.mxu1 %v1533_v63 }
 0x1b6   : > { %997 = vmatpush.msra.mxu1 %v1352_v55  ;;  %v1338_v55 = vld [vmem:[%s1461_s24 + $0x708] sm:$0xff] }
 0x1b8   : > { %998 = vmatpush.msra.mxu1 %v1351_v58  ;;  %v1401_v58 = vld [vmem:[%s1865_s1 + $0x8] sm:$0xff] }
 0x1ba   : > { %999 = vmatpush.msra.mxu1 %v1350_v61  ;;  %v1403_v61 = vld [vmem:[%s1865_s1 + $0x10] sm:$0xff] }
 0x1bc   : > { %1000 = vmatpush.msra.mxu1 %v1349_v4  ;;  %970 = vmatmul.f32.gmra.mxu3 %v1402_v60  ;;  %v1362_v4 = vld [vmem:[%s1461_s24 + $0x7c8] sm:$0xff] }
 0x1bd   : > { %827 = vmatmul.f32.gmra.mxu1 %v1562_v7 }
 0x1be   : > { %1001 = vmatpush.msra.mxu1 %v1348_v12  ;;  %v1360_v12 = vld [vmem:[%s1461_s24 + $0x7b8] sm:$0xff] }
 0x1c0   : > { %1002 = vmatpush.msra.mxu1 %v1347_v16  ;;  %v1356_v16 = vld [vmem:[%s1461_s24 + $0x798] sm:$0xff] }
 0x1c2   : > { %1003 = vmatpush.msra.mxu1 %v1346_v3  ;;  %v1353_v3 = vld [vmem:[%s1461_s24 + $0x780] sm:$0xff] }
 0x1c4   : > { %1004 = vmatpush.msra.mxu1 %v1345_v23 }
 0x1c6   : > { %1005 = vmatpush.msra.mxu1 %v1344_v9 }
 0x1c8   : > { %1006 = vmatpush.msra.mxu1 %v1343_v31 }
 0x1ca   : > { %1007 = vmatpush.msra.mxu1 %v1342_v34 }
 0x1df   : > { %v756_v41 = vpop.f32.mrf.mxu2 }
 0x1e0   : > { %v779_v63 = vpop.f32.mrf.mxu3 }
 0x1e1   : > { %v780_v7 = vadd.f32 %v779_v63, %v756_v41  ;;  %v1324_v41 = vld [vmem:[%s1461_s24 + $0x698] sm:$0xff]  ;;  %v1341_v63 = vld [vmem:[%s1461_s24 + $0x720] sm:$0xff] }
 0x1e2   : > { %986 = vmatpush.msra.mxu0 %v1324_v41  ;;  %1008 = vmatpush.msra.mxu1 %v1341_v63 }
 0x1e3   : > { %v803_v43 = vadd.f32 %v802_v42, %v780_v7  ;;  %v1323_v42 = vld [vmem:[%s1461_s24 + $0x690] sm:$0xff] }
 0x1e4   : > { %987 = vmatpush.msra.mxu0 %v1323_v42 }
 0x1e6   : > { %988 = vmatpush.msra.mxu0 %v1322_v48 }
 0x1e7   : > { %v759_v19 = vpop.f32.mrf.mxu2 }
 0x1e8   : > { %v782_v20 = vpop.f32.mrf.mxu3  ;;  %989 = vmatpush.msra.mxu0 %v1321_v2  ;;  %v423_v2 = vpop.xlane.xlu1 %422 }
 0x1e9   : > { %v783_v25 = vadd.f32 %v782_v20, %v759_v19  ;;  %990 = vmatmul.f32.vlgmr.msra.gmra.mxu0 %v1401_v58  ;;  %v1406_v19 = vld [vmem:[%s1865_s1 + $0x18] sm:$0xff] }
 0x1ea   : > { %v1407_v20 = vld [vmem:[%s1865_s1 + $0x38] sm:$0xff] }
 0x212   : > { %v665_v35 = vpop.f32.mrf.mxu1 }
 0x213   : > { %v666_v36 = vadd.f32 %v665_v35, %v1659_v49  ;;  %v806_v35 = vadd.f32 %v805_v26, %v783_v25 }
 0x215   : > { %v668_v37 = vmul.f32 %v666_v36, %v1664_v51 }
 0x217   : > { %v669_v38 = vsel %vm456_vm5, %v668_v37, 0.0 }
 0x218   : > { %670 = vadd.xlane.f32.xlu2 %v669_v38 }
 0x232   : > { %v825_v45 = vpop.f32.mrf.mxu1 }
 0x233   : > { %v826_v46 = vadd.f32 %v825_v45, %v803_v43  ;;  %v1340_v43 = vld [vmem:[%s1461_s24 + $0x718] sm:$0xff] }
 0x234   : > { %1009 = vmatpush.msra.mxu1 %v1340_v43 }
 0x235   : > { %v1302_v50 = vmul.f32 -1.442695, %v826_v46  ;;  %v851_v52 = vsel %vm420_vm0, %v826_v46, -inf }
 0x236   : > { %852 = vmax.xlane.f32.xlu0 %v851_v52 }
 0x237   : > { %1393 = vpow2.f32 %v1302_v50  ;;  %v1339_v50 = vld [vmem:[%s1461_s24 + $0x710] sm:$0xff]  ;;  %v968_v8 = vpop.f32.mrf.mxu3 }
 0x238   : > { %1010 = vmatpush.msra.mxu1 %v1339_v50 }
 0x23a   : > { %v828_v37 = vpop.f32.mrf.mxu1  ;;  %1011 = vmatpush.msra.mxu1 %v1338_v55  ;;  %v459_v55 = vpop.xlane.xlu1 %458 }
 0x23b   : > { %v829_v44 = vadd.f32 %v828_v37, %v806_v35 }
 0x23c   : > { %1012 = vmatpush.msra.mxu1 %v1337_v56  ;;  %v641_v56 = vpop.xlane.xlu2 %640 }
 0x23d   : > { %v1394_v5 = vpop.eup %1393  ;;  %v831_v53 = vadd.f32 %v829_v44, %v1632_v27  ;;  %1013 = vmatmul.f32.vlgmr.msra.gmra.mxu1 %v1403_v61  ;;  %v460_v61 = vadd.f32 %v459_v55, %v423_v2 }
 0x23e   : > { %v1769_v13 = vadd.f32 1.0, %v1394_v5  ;;  %v1404_v5 = vld [vmem:[%s1865_s1 + $0x28] sm:$0xff] }
 0x23f   : > { %993 = vmatmul.f32.gmra.mxu0 %v1404_v5  ;;  %v971_v33 = vpop.f32.mrf.mxu3 }
 0x240   : > { %1395 = vrcp.f32 %v1769_v13  ;;  %v847_v36 = vand.u32 2147483648, %v1769_v13  ;;  %v845_v39 = vand.u32 2147483647, %v1769_v13  ;;  %vm841_vm11 = vweird.f32 %v1769_v13 }
 0x242   : > { %v848_v45 = vor.u32 1.1754944e-38, %v847_v36  ;;  %vm846_vm13 = vcmp.eq.f32.partialorder %v845_v39, 8.507059e+37 }
 0x245   : > { %1016 = vmatmul.f32.gmra.mxu1 %v1405_v11 }
 0x246   : > { %v1396_v62 = vpop.eup %1395 }
 0x247   : > { %v837_v28 = vmul.f32 %v1396_v62, %v1769_v13  ;;  %vm842_vm10 = vweird.f32 %v1396_v62  ;;  %v1359_v13 = vld [vmem:[%s1461_s24 + $0x7b0] sm:$0xff]  ;;  %s1167_s24 = sshll.u32 %s1873_s19, 3 }
 0x248   : > { %vm843_vm12 = vmor %vm841_vm11, %vm842_vm10  ;;  %s227_s16 = scalar_lea.vmem %s1869_s5, %s1167_s24 }
 0x249   : > { %v838_v32 = vsub.f32 1.0, %v837_v28 }
 0x24b   : > { %v839_v38 = vmul.f32 %v1396_v62, %v838_v32 }
 0x24d   : > { %v840_v7 = vadd.f32 %v1396_v62, %v839_v38 }
 0x24f   : > { %v844_v46 = vsel %vm843_vm12, %v1396_v62, %v840_v7 }
 0x250   : > { %v849_v52 = vsel %vm846_vm13, %v848_v45, %v844_v46 }
 0x251   : > { %1303 = vmatpush.xpose.msk.msrb.mxu2 %vm420_vm0, %v849_v52 }
 0x254   : > { %1304 = vmatmul.msk.f32.vlgmr.msrb.gmra.mxu2 %vm420_vm0, %v831_v53 }
 0x255   : > { %1020 = vmatpush.msra.mxu2 %v1368_v47 }
 0x257   : > { %1021 = vmatpush.msra.mxu2 %v1367_v54 }
 0x259   : > { %1022 = vmatpush.msra.mxu2 %v1366_v57 }
 0x25b   : > { %1023 = vmatpush.msra.mxu2 %v1365_v59 }
 0x25d   : > { %1024 = vmatpush.msra.mxu2 %v1364_v0 }
 0x25f   : > { %1025 = vmatpush.msra.mxu2 %v1363_v1 }
 0x261   : > { %1026 = vmatpush.msra.mxu2 %v1362_v4  ;;  %v461_v4 = vmul.f32 0.5, %v460_v61 }
 0x263   : > { %1027 = vmatpush.msra.mxu2 %v1361_v10 }
 0x265   : > { %1028 = vmatpush.msra.mxu2 %v1360_v12 }
 0x266   : > { %v991_v9 = vpop.f32.mrf.mxu0 }
 0x267   : > { %1029 = vmatpush.msra.mxu2 %v1359_v13  ;;  %v992_v62 = vadd.f32 %v991_v9, %v968_v8 }
 0x269   : > { %1030 = vmatpush.msra.mxu2 %v1358_v14 }
 0x26b   : > { %1031 = vmatpush.msra.mxu2 %v1357_v15 }
 0x26d   : > { %1032 = vmatpush.msra.mxu2 %v1356_v16 }
 0x26f   : > { %1033 = vmatpush.msra.mxu2 %v1355_v17 }
 0x271   : > { %1034 = vmatpush.msra.mxu2 %v1354_v18 }
 0x273   : > { %1035 = vmatpush.msra.mxu2 %v1353_v3 }
 0x274   : > { %1036 = vmatmul.f32.vlgmr.msra.gmra.mxu2 %v1406_v19 }
 0x27c   : > { %1039 = vmatmul.f32.gmra.mxu2 %v1407_v20 }
 0x28b   : > { %v671_v57 = vpop.xlane.xlu2 %670 }
 0x28c   : > { %v672_v59 = vadd.f32 %v671_v57, %v641_v56 }
 0x28e   : > { %v673_v0 = vmul.f32 0.5, %v672_v59 }
 0x2a9   : > { %v853_v60 = vpop.xlane.xlu0 %852 }
 0x2ba   : > { %v1014_v25 = vpop.f32.mrf.mxu1 }
 0x2bb   : > { %v1015_v26 = vadd.f32 %v1014_v25, %v992_v62 }
 0x2bc   : > { %v994_v34 = vpop.f32.mrf.mxu0 }
 0x2bd   : > { %v995_v36 = vadd.f32 %v994_v34, %v971_v33 }
 0x2c2   : > { %v1017_v37 = vpop.f32.mrf.mxu1 }
 0x2c3   : > { %v1018_v40 = vadd.f32 %v1017_v37, %v995_v36 }
 0x2d7   : > { %v877_v21 = vpop.f32.mrf.mxu2 }
 0x2d8   : > { %v878_v22 = vadd.f32 %v877_v21, %v1659_v49 }
 0x2da   : > { %v880_v23 = vmul.f32 %v878_v22, %v1664_v51 }
 0x2dc   : > { %v881_v24 = vsel %vm456_vm5, %v880_v23, 0.0 }
 0x2dd   : > { %882 = vadd.xlane.f32.xlu1 %v881_v24 }
 0x2f7   : > { %v1037_v28 = vpop.f32.mrf.mxu2 }
 0x2f8   : > { %v1038_v29 = vadd.f32 %v1037_v28, %v1015_v26 }
 0x2fa   : > { %v1369_v30 = vmul.f32 -1.442695, %v1038_v29  ;;  %v1063_v31 = vsel %vm420_vm0, %v1038_v29, -inf }
 0x2fb   : > { %1064 = vmax.xlane.f32.xlu2 %v1063_v31 }
 0x2fc   : > { %1397 = vpow2.f32 %v1369_v30 }
 0x2ff   : > { %v1040_v63 = vpop.f32.mrf.mxu2 }
 0x300   : > { %v1041_v44 = vadd.f32 %v1040_v63, %v1018_v40 }
 0x302   : > { %v1398_v32 = vpop.eup %1397  ;;  %v1043_v48 = vadd.f32 %v1041_v44, %v1632_v27 }
 0x303   : > { %v1047_v6 = vadd.f32 1.0, %v1398_v32 }
 0x305   : > { %1399 = vrcp.f32 %v1047_v6  ;;  %v1059_v41 = vand.u32 2147483648, %v1047_v6  ;;  %v1057_v42 = vand.u32 2147483647, %v1047_v6  ;;  %vm1053_vm15 = vweird.f32 %v1047_v6 }
 0x307   : > { %v1060_v45 = vor.u32 1.1754944e-38, %v1059_v41  ;;  %vm1058_vm2 = vcmp.eq.f32.partialorder %v1057_v42, 8.507059e+37 }
 0x30b   : > { %v1400_v35 = vpop.eup %1399 }
 0x30c   : > { %v1049_v38 = vmul.f32 %v1400_v35, %v1047_v6  ;;  %vm1054_vm14 = vweird.f32 %v1400_v35 }
 0x30d   : > { %vm1055_vm1 = vmor %vm1053_vm15, %vm1054_vm14 }
 0x30e   : > { %v1050_v39 = vsub.f32 1.0, %v1049_v38 }
 0x310   : > { %v1051_v7 = vmul.f32 %v1400_v35, %v1050_v39 }
 0x312   : > { %v1052_v43 = vadd.f32 %v1400_v35, %v1051_v7 }
 0x314   : > { %v1056_v46 = vsel %vm1055_vm1, %v1400_v35, %v1052_v43 }
 0x315   : > { %v1061_v47 = vsel %vm1058_vm2, %v1060_v45, %v1056_v46 }
 0x316   : > { %1370 = vmatpush.xpose.msk.msra.mxu3 %vm420_vm0, %v1061_v47 }
 0x319   : > { %1371 = vmatmul.msk.f32.vlgmr.msra.gmra.mxu3 %vm420_vm0, %v1043_v48  ;;  %vm1098_vm0 = vcmask 7168  }
 0x31a   : > { %v1099_v10 = vsel %vm1098_vm0, %v461_v4, %v673_v0 }
 0x350   : > { %v883_v58 = vpop.xlane.xlu1 %882 }
 0x351   : > { %v884_v27 = vadd.f32 %v883_v58, %v853_v60 }
 0x353   : > { %v885_v1 = vmul.f32 0.5, %v884_v27 }
 0x355   : > { %v1101_v12 = vsel %vm1100_vm3, %v1099_v10, %v885_v1 }
 0x39c   : > { %v1089_v50 = vpop.f32.mrf.mxu3 }
 0x39d   : > { %v1090_v52 = vadd.f32 %v1089_v50, %v1659_v49  ;;  %v1065_v49 = vpop.xlane.xlu2 %1064 }
 0x39f   : > { %v1092_v53 = vmul.f32 %v1090_v52, %v1664_v51 }
 0x3a1   : > { %v1093_v54 = vsel %vm456_vm5, %v1092_v53, 0.0  ;;  %vm1104_vm5 = vcmask 31744  }
 0x3a2   : > { %1094 = vadd.xlane.f32.xlu1 %v1093_v54 }
 0x415   : > { %v1095_v51 = vpop.xlane.xlu1 %1094 }
 0x416   : > { %v1096_v5 = vadd.f32 %v1095_v51, %v1065_v49 }
 0x418   : > { %v1097_v11 = vmul.f32 0.5, %v1096_v5 }
 0x41a   : > { %v1103_v13 = vsel %vm1102_vm4, %v1101_v12, %v1097_v11 }
 0x41b   : > { %1105 = vst.msk [vmem:[%s227_s16] sm:$0xff] %vm1104_vm5, %v1103_v13 }
 0x41c PF: > { %s15_s18 = sadd.s32 1, %s1414_s18  }
 0x41d   : > { %p12_p5 = scmp.ge.s32.totalorder %s15_s18, 4  }
 0x41f   :  { %14 = sbr.rel (!%p12_p5) target bundleno = 1 (0x1), region = 73 }

</bundles_post_ra>
